<compile_context>
chip_gen: v6e
topology: v6e:2x2x1
jax: 0.10.0
libtpu: 0.0.40
codegen_flags: <defaults>
</compile_context>

<pallas_src>
import functools

import jax
import jax.numpy as jnp
from jax.experimental import pallas as pl
from jax.experimental.pallas import tpu as pltpu

LANE = 128


def _round_up(x, m):
    return (x + m - 1) // m * m


def _choose_tm(batch):
    """Batch tile: big enough to amortize per-step overhead, small enough to
    keep >=2 grid steps on large batches (v7x dual-TensorCore sharding)."""
    b8 = _round_up(batch, 8)
    if b8 <= 256:               # tiny batches: one step; overhead-bound either way
        return b8
    half = _round_up(b8 // 2, LANE)
    return max(LANE, min(2048, half))


def mlp_kernel(x_ref, w1_ref, w2_ref, w3_ref, b_ref, o_ref, *, w_p, matmul_dtype):
    # x_ref : (tm, d_in)   f32 (raw, unpadded) -> cast in-kernel
    # w1_ref: (d_in, w_p)  matmul dtype   (K unpadded to match raw x, N padded)
    # w2_ref: (w_p, w_p)   matmul dtype
    # w3_ref: (w_p, w_p)   matmul dtype
    # b_ref : (1, 3*w_p)   f32  (b1 | b2 | b3 along lanes, zero-padded)
    # o_ref : (tm, n_out)  f32  (compact logits, lane dim == full output width)
    mm = matmul_dtype
    x = x_ref[...].astype(mm)                     # in-kernel cast, no wrapper HBM pass
    b1 = b_ref[:, 0 * w_p:1 * w_p]
    b2 = b_ref[:, 1 * w_p:2 * w_p]
    b3 = b_ref[:, 2 * w_p:3 * w_p]

    # Layer 1: MXU matmul, f32 accumulation, f32 bias + ReLU epilogue.
    a1 = jnp.maximum(
        jnp.dot(x, w1_ref[...], preferred_element_type=jnp.float32) + b1, 0.0)
    # Layer 2
    a2 = jnp.maximum(
        jnp.dot(a1.astype(mm), w2_ref[...], preferred_element_type=jnp.float32) + b2, 0.0)
    # Layer 3 (logits); store only the real output lanes (compact writeback).
    y = jnp.dot(a2.astype(mm), w3_ref[...], preferred_element_type=jnp.float32) + b3
    o_ref[...] = y[:, :o_ref.shape[1]].astype(o_ref.dtype)


def prepare_params(params, matmul_dtype=jnp.bfloat16):
    """Pad/cast the weights ONCE (hoisted out of the per-forward path).

    params = (w1, b1, w2, b2, w3, b3); weights stored (in, out), biases (1, out).
    Zero padding is exact through ReLU (zero rows/cols + zero biases).
    Use matmul_dtype=jnp.float32 on v5e.
    """
    w1, b1, w2, b2, w3, b3 = params
    d_in = w1.shape[0]
    h1, h2, n_out = w1.shape[1], w2.shape[1], w3.shape[1]
    w_p = _round_up(max(h1, h2, n_out), LANE)     # common padded hidden width (=128)

    def pad2(a, rows, cols):
        return jnp.pad(a, ((0, rows - a.shape[0]), (0, cols - a.shape[1])))

    w1_p = pad2(w1, d_in, w_p).astype(matmul_dtype)   # K stays = d_in (matches raw x)
    w2_p = pad2(w2, w_p, w_p).astype(matmul_dtype)
    w3_p = pad2(w3, w_p, w_p).astype(matmul_dtype)
    b_slab = jnp.concatenate(
        [pad2(b1, 1, w_p), pad2(b2, 1, w_p), pad2(b3, 1, w_p)], axis=1
    ).astype(jnp.float32)
    return dict(w1=w1_p, w2=w2_p, w3=w3_p, b=b_slab,
                w_p=w_p, n_out=n_out, matmul_dtype=matmul_dtype)


def neural_network_forward(x, prepared, *, tm=None):
    """Forward pass. x: (batch, num_inputs) f32. Returns (batch, num_outputs) f32."""
    batch, d_in = x.shape
    w1_p, w2_p, w3_p, b_slab = prepared["w1"], prepared["w2"], prepared["w3"], prepared["b"]
    w_p, n_out = prepared["w_p"], prepared["n_out"]
    assert w1_p.shape[0] == d_in, "prepared params do not match input width"

    if tm is None:
        tm = _choose_tm(batch)
    grid = (pl.cdiv(batch, tm),)   # partial last block: OOB reads unused, OOB writes dropped

    kernel = functools.partial(
        mlp_kernel, w_p=w_p, matmul_dtype=prepared["matmul_dtype"])

    return pl.pallas_call(
        kernel,
        out_shape=jax.ShapeDtypeStruct((batch, n_out), jnp.float32),
        grid=grid,
        in_specs=[
            pl.BlockSpec((tm, d_in), lambda i: (i, 0)),       # x tile: raw f32, pipelined
            pl.BlockSpec(w1_p.shape, lambda i: (0, 0)),       # weights: VMEM-resident
            pl.BlockSpec(w2_p.shape, lambda i: (0, 0)),
            pl.BlockSpec(w3_p.shape, lambda i: (0, 0)),
            pl.BlockSpec(b_slab.shape, lambda i: (0, 0)),     # biases: VMEM-resident
        ],
        out_specs=pl.BlockSpec((tm, n_out), lambda i: (i, 0)),  # compact logits stream
        compiler_params=pltpu.CompilerParams(
            dimension_semantics=("parallel",),                # dual-TC sharding on v7x
            vmem_limit_bytes=32 * 1024 * 1024,                # headroom, safe on all gens
        ),
    )(x, w1_p, w2_p, w3_p, b_slab)


def init_params(key, num_inputs, num_outputs):
    """Deterministic init matching torch.nn.Linear (stored transposed: (in, out))."""
    dims = [(num_inputs, 30), (30, 20), (20, num_outputs)]
    params = []
    for i, (fan_in, fan_out) in enumerate(dims):
        kw, kb = jax.random.split(jax.random.fold_in(key, i))
        bound = 1.0 / jnp.sqrt(fan_in)  # torch default uniform bound
        w = jax.random.uniform(kw, (fan_in, fan_out), jnp.float32, -bound, bound)
        b = jax.random.uniform(kb, (1, fan_out), jnp.float32, -bound, bound)
        params.extend([w, b])
    return tuple(params)


def reference_forward(x, params, matmul_dtype=jnp.float32):
    """Pure-JAX reference with the same dtype policy as the kernel."""
    w1, b1, w2, b2, w3, b3 = params
    c = lambda a: a.astype(matmul_dtype)
    h1 = jnp.maximum(
        jnp.dot(c(x), c(w1), preferred_element_type=jnp.float32) + b1, 0.0)
    h2 = jnp.maximum(
        jnp.dot(c(h1), c(w2), preferred_element_type=jnp.float32) + b2, 0.0)
    return jnp.dot(c(h2), c(w3), preferred_element_type=jnp.float32) + b3


if __name__ == "__main__":
    num_inputs, num_outputs = 32, 10
    batch = 8

    key = jax.random.PRNGKey(0)
    kx, kp = jax.random.split(key)
    x = jax.random.normal(kx, (batch, num_inputs), jnp.float32)
    params = init_params(kp, num_inputs, num_outputs)

    # Params are prepared ONCE (cache this in real use), then reused every forward.
    prepared_bf16 = prepare_params(params, matmul_dtype=jnp.bfloat16)  # v6e/v7x default
    out = neural_network_forward(x, prepared_bf16)
    out = jax.block_until_ready(out)
    assert out.shape == (batch, num_outputs)
    assert out.dtype == jnp.float32

    ref_bf16 = reference_forward(x, params, matmul_dtype=jnp.bfloat16)
    ref_f32 = reference_forward(x, params, matmul_dtype=jnp.float32)
    assert jnp.allclose(out, ref_bf16, atol=1e-2, rtol=1e-2)
    assert jnp.allclose(out, ref_f32, atol=5e-2, rtol=5e-2)

    # v5e-friendly all-f32 path (no bf16 casts anywhere) — tight match to f32 ref.
    prepared_f32 = prepare_params(params, matmul_dtype=jnp.float32)
    out_f32 = jax.block_until_ready(neural_network_forward(x, prepared_f32))
    assert jnp.allclose(out_f32, ref_f32, atol=1e-5, rtol=1e-5)

    print("KERNEL_OK")
</pallas_src>

<mosaic_0001>
module attributes {stable_mosaic.version = 11 : i64} {
  func.func @mlp_kernel(%arg0: i32, %arg1: memref<8x32xf32, #tpu.memory_space<vmem>>, %arg2: memref<32x128xbf16, #tpu.memory_space<vmem>>, %arg3: memref<128x128xbf16, #tpu.memory_space<vmem>>, %arg4: memref<128x128xbf16, #tpu.memory_space<vmem>>, %arg5: memref<1x384xf32, #tpu.memory_space<vmem>>, %arg6: memref<8x10xf32, #tpu.memory_space<vmem>>) attributes {dimension_semantics = [#tpu.dimension_semantics<parallel>], iteration_bounds = array<i64: 1>, scalar_prefetch = 0 : i64, scratch_operands = 0 : i64, tpu.core_type = #tpu.core_type<tc>, window_params = [{transform_indices = @transform_0, window_bounds = array<i64: 8, 32>}, {pipeline_mode = #tpu.pipeline_mode<synchronous>, transform_indices = @transform_1, window_bounds = array<i64: 32, 128>}, {pipeline_mode = #tpu.pipeline_mode<synchronous>, transform_indices = @transform_2, window_bounds = array<i64: 128, 128>}, {pipeline_mode = #tpu.pipeline_mode<synchronous>, transform_indices = @transform_3, window_bounds = array<i64: 128, 128>}, {pipeline_mode = #tpu.pipeline_mode<synchronous>, transform_indices = @transform_4, window_bounds = array<i64: 1, 384>}, {transform_indices = @transform_5, window_bounds = array<i64: 8, 10>}]} {
    %c0 = arith.constant 0 : index
    %c0_0 = arith.constant 0 : index
    %0 = vector.load %arg1[%c0, %c0_0] : memref<8x32xf32, #tpu.memory_space<vmem>>, vector<8x32xf32>
    %1 = arith.truncf %0 : vector<8x32xf32> to vector<8x32xbf16>
    %c0_1 = arith.constant 0 : index
    %c0_2 = arith.constant 0 : index
    %2 = vector.load %arg5[%c0_1, %c0_2] : memref<1x384xf32, #tpu.memory_space<vmem>>, vector<1x128xf32>
    %c0_3 = arith.constant 0 : index
    %c128 = arith.constant 128 : index
    %3 = vector.load %arg5[%c0_3, %c128] : memref<1x384xf32, #tpu.memory_space<vmem>>, vector<1x128xf32>
    %c0_4 = arith.constant 0 : index
    %c256 = arith.constant 256 : index
    %4 = vector.load %arg5[%c0_4, %c256] : memref<1x384xf32, #tpu.memory_space<vmem>>, vector<1x128xf32>
    %c0_5 = arith.constant 0 : index
    %c0_6 = arith.constant 0 : index
    %5 = vector.load %arg2[%c0_5, %c0_6] : memref<32x128xbf16, #tpu.memory_space<vmem>>, vector<32x128xbf16>
    %cst = arith.constant dense<0.000000e+00> : vector<8x128xf32>
    %6 = tpu.matmul %1, %5, %cst {dimension_numbers = #tpu.dot_dimension_numbers<[1], [0], [0], [1], [0, 0, 1, 1], [], []>} : vector<8x32xbf16>, vector<32x128xbf16>, vector<8x128xf32> -> vector<8x128xf32>
    %7 = vector.broadcast %2 : vector<1x128xf32> to vector<8x128xf32>
    %8 = arith.addf %6, %7 : vector<8x128xf32>
    %cst_7 = arith.constant 0.000000e+00 : f32
    %9 = vector.broadcast %cst_7 : f32 to vector<8x128xf32>
    %10 = arith.maximumf %8, %9 : vector<8x128xf32>
    %11 = arith.truncf %10 : vector<8x128xf32> to vector<8x128xbf16>
    %c0_8 = arith.constant 0 : index
    %c0_9 = arith.constant 0 : index
    %12 = vector.load %arg3[%c0_8, %c0_9] : memref<128x128xbf16, #tpu.memory_space<vmem>>, vector<128x128xbf16>
    %cst_10 = arith.constant dense<0.000000e+00> : vector<8x128xf32>
    %13 = tpu.matmul %11, %12, %cst_10 {dimension_numbers = #tpu.dot_dimension_numbers<[1], [0], [0], [1], [0, 0, 1, 1], [], []>} : vector<8x128xbf16>, vector<128x128xbf16>, vector<8x128xf32> -> vector<8x128xf32>
    %14 = vector.broadcast %3 : vector<1x128xf32> to vector<8x128xf32>
    %15 = arith.addf %13, %14 : vector<8x128xf32>
    %cst_11 = arith.constant 0.000000e+00 : f32
    %16 = vector.broadcast %cst_11 : f32 to vector<8x128xf32>
    %17 = arith.maximumf %15, %16 : vector<8x128xf32>
    %18 = arith.truncf %17 : vector<8x128xf32> to vector<8x128xbf16>
    %c0_12 = arith.constant 0 : index
    %c0_13 = arith.constant 0 : index
    %19 = vector.load %arg4[%c0_12, %c0_13] : memref<128x128xbf16, #tpu.memory_space<vmem>>, vector<128x128xbf16>
    %cst_14 = arith.constant dense<0.000000e+00> : vector<8x128xf32>
    %20 = tpu.matmul %18, %19, %cst_14 {dimension_numbers = #tpu.dot_dimension_numbers<[1], [0], [0], [1], [0, 0, 1, 1], [], []>} : vector<8x128xbf16>, vector<128x128xbf16>, vector<8x128xf32> -> vector<8x128xf32>
    %21 = vector.broadcast %4 : vector<1x128xf32> to vector<8x128xf32>
    %22 = arith.addf %20, %21 : vector<8x128xf32>
    %23 = vector.extract_strided_slice %22 {offsets = [0, 0], sizes = [8, 10], strides = [1, 1]} : vector<8x128xf32> to vector<8x10xf32>
    %c0_15 = arith.constant 0 : index
    %c0_16 = arith.constant 0 : index
    %24 = vector.load %arg6[%c0_15, %c0_16] : memref<8x10xf32, #tpu.memory_space<vmem>>, vector<8x10xf32>
    tpu.vector_store %arg6[%c0_15, %c0_16], %23 {strides = array<i32>} : memref<8x10xf32, #tpu.memory_space<vmem>>, vector<8x10xf32>,
    return
  }
  func.func @transform_0(%arg0: i32) -> (i32, i32) {
    %c0_i32 = arith.constant 0 : i32
    %c0_i32_0 = arith.constant 0 : i32
    return %arg0, %c0_i32 : i32, i32
  }
  func.func @transform_1(%arg0: i32) -> (i32, i32) {
    %c0_i32 = arith.constant 0 : i32
    %c0_i32_0 = arith.constant 0 : i32
    %c0_i32_1 = arith.constant 0 : i32
    return %c0_i32, %c0_i32_0 : i32, i32
  }
  func.func @transform_2(%arg0: i32) -> (i32, i32) {
    %c0_i32 = arith.constant 0 : i32
    %c0_i32_0 = arith.constant 0 : i32
    %c0_i32_1 = arith.constant 0 : i32
    return %c0_i32, %c0_i32_0 : i32, i32
  }
  func.func @transform_3(%arg0: i32) -> (i32, i32) {
    %c0_i32 = arith.constant 0 : i32
    %c0_i32_0 = arith.constant 0 : i32
    %c0_i32_1 = arith.constant 0 : i32
    return %c0_i32, %c0_i32_0 : i32, i32
  }
  func.func @transform_4(%arg0: i32) -> (i32, i32) {
    %c0_i32 = arith.constant 0 : i32
    %c0_i32_0 = arith.constant 0 : i32
    %c0_i32_1 = arith.constant 0 : i32
    return %c0_i32, %c0_i32_0 : i32, i32
  }
  func.func @transform_5(%arg0: i32) -> (i32, i32) {
    %c0_i32 = arith.constant 0 : i32
    %c0_i32_0 = arith.constant 0 : i32
    return %arg0, %c0_i32 : i32, i32
  }
}

</mosaic_0001>

<bundles_post_ra>
// kernel: tpu_custom_call.1
= control target key start
LH: loop header
LB: loop body
LE: loop exit
PB: predicated region body
PF: predicated region fallthrough
CT: control target
= control target key end

     0   :  { %10 = vsyncpa [#allocation3], 0  ;;  %s711_s0 = inlined_call_operand.hbm [shape: f32[8,32], index: 0, kind: input, shape index: {}]   ;;  %s712_s1 = inlined_call_operand.hbm [shape: bf16[32,128], index: 1, kind: input, shape index: {}]   ;;  %s713_s2 = inlined_call_operand.hbm [shape: bf16[128,128], index: 2, kind: input, shape index: {}]   ;;  %s714_s3 = inlined_call_operand.hbm [shape: bf16[128,128], index: 3, kind: input, shape index: {}]   ;;  %s715_s4 = inlined_call_operand.vmem [shape: f32[1,384], index: 4, kind: input, shape index: {}]   ;;  %s716_s5 = inlined_call_operand.hbm [shape: f32[8,10], index: 5, kind: output, shape index: {}]  }
   0x1   :  { %11 = vsyncpa [#allocation6], 0 }
   0x2   :  { %12 = vsyncpa [#allocation9], 0 }
   0x3   :  { %13 = vsyncpa [#allocation4], 0  ;;  %s615_s18 = smov [#allocation5]  }
   0x4   :  { %s29_s19 = sshll.u32 %s615_s18, 4  ;;  %s30_s19 = int_to_ptr.vmem [resolvable:$true] %s29_s19 }
   0x5   :  { %s515_s20 = scalar_lea.vmem %s30_s19, 256  ;;  %p520_p1 = scmp.lt.s32.totalorder %s30_s19, %s30_s19 }
   0x6   :  { %p516_p0 = scmp.ne.s32.totalorder %s30_s19, %s515_s20  ;;  %p521_p2 = scmp.lt.s32.totalorder %s515_s20, %s515_s20 }
   0x8   :  { %p522_p3 = por %p521_p2, %p520_p1 }
   0xa   :  { %p523_p4 = pnand %p522_p3, %p516_p0 }
   0xc   :  { %526 = shalt.err (!%p523_p4)
}
   0xd   :  { %s616_s21 = smov 64   ;;  %s617_s22 = smov 4  }
   0xe   :  { %35 = dma.hbm_to_vmem [thread:$0]  %s712_s1, 256, %s30_s19, [#allocation6], %s616_s21, %s616_s21, %s617_s22  }
   0xf   :  { %s618_s25 = smov [#allocation2]   ;;  %s619_s27 = smov [#allocation7]  }
  0x10   :  { %s20_s26 = sshll.u32 %s618_s25, 4  ;;  %s41_s28 = sshll.u32 %s619_s27, 4  ;;  %s21_s26 = int_to_ptr.vmem [resolvable:$true] %s20_s26  ;;  %s42_s28 = int_to_ptr.vmem [resolvable:$true] %s41_s28 }
  0x11   :  { %s535_s29 = scalar_lea.vmem %s21_s26, 128  ;;  %p540_p6 = scmp.lt.s32.totalorder %s21_s26, %s21_s26 }
  0x12   :  { %p536_p5 = scmp.ne.s32.totalorder %s21_s26, %s535_s29  ;;  %p541_p7 = scmp.lt.s32.totalorder %s535_s29, %s535_s29 }
  0x14   :  { %p542_p8 = por %p541_p7, %p540_p6 }
  0x16   :  { %p543_p9 = pnand %p542_p8, %p536_p5 }
  0x18   :  { %546 = shalt.err (!%p543_p9)
}
  0x19   :  { %23 = dma.hbm_to_vmem [thread:$0]  %s711_s0, 128, %s21_s26, [#allocation3]  }
  0x1a   :  { %s555_s7 = scalar_lea.vmem %s42_s28, 1024  ;;  %p560_p11 = scmp.lt.s32.totalorder %s42_s28, %s42_s28 }
  0x1b   :  { %p556_p10 = scmp.ne.s32.totalorder %s42_s28, %s555_s7  ;;  %p561_p12 = scmp.lt.s32.totalorder %s555_s7, %s555_s7 }
  0x1d   :  { %p562_p13 = por %p561_p12, %p560_p11 }
  0x1f   :  { %p563_p0 = pnand %p562_p13, %p556_p10 }
  0x21   :  { %566 = shalt.err (!%p563_p0)
}
  0x22   :  { %47 = dma.hbm_to_vmem [thread:$0]  %s713_s2, 1024, %s42_s28, [#allocation6], %s616_s21, %s616_s21, %s617_s22  }
  0x23   :  { %s620_s9 = smov [#allocation8]  }
  0x24   :  { %s53_s10 = sshll.u32 %s620_s9, 4  ;;  %s54_s10 = int_to_ptr.vmem [resolvable:$true] %s53_s10 }
  0x25   :  { %s575_s11 = scalar_lea.vmem %s54_s10, 1024  ;;  %p580_p2 = scmp.lt.s32.totalorder %s54_s10, %s54_s10 }
  0x26   :  { %p576_p1 = scmp.ne.s32.totalorder %s54_s10, %s575_s11  ;;  %p581_p3 = scmp.lt.s32.totalorder %s575_s11, %s575_s11 }
  0x28   :  { %p582_p4 = por %p581_p3, %p580_p2 }
  0x2a   :  { %p583_p5 = pnand %p582_p4, %p576_p1 }
  0x2c   :  { %586 = shalt.err (!%p583_p5)
}
  0x2d   :  { %59 = dma.hbm_to_vmem [thread:$0]  %s714_s3, 1024, %s54_s10, [#allocation9], %s616_s21, %s616_s21, %s617_s22  }
  0x2e   :  { %607 = dma.done.wait [#allocation3], 128  }
  0x2f   :  { %608 = vsyncadd [#allocation3], 4294967168 }
  0x30   :  { %609 = dma.done.wait [#allocation6], 1280  }
  0x31   :  { %610 = vsyncadd [#allocation6], 4294966016 }
  0x32   :  { %611 = dma.done.wait [#allocation9], 1024  }
  0x33   :  { %612 = vsyncadd [#allocation9], 4294966272  ;;  %v621_v0 = vmov 0.0   ;;  %vm622_vm0 = vmmov 0   ;;  %v489_v1 = vld [vmem:[#allocation5 + $0x8] sm:$0xff]   ;;  %v490_v2 = vld [vmem:[#allocation5] sm:$0xff]  }
  0x34   :  { %432 = vmatprep.subr.bf16.mxu0 %v621_v0  ;;  %436 = vmatprep.mubr.msk.bf16.mxu0 %vm622_vm0, %v621_v0  ;;  %v75_v3 = vld [vmem:[#allocation2] sm:$0xff]  ;;  %v491_v4 = vld [vmem:[#allocation7 + $0x38] sm:$0xff]   ;;  %v492_v6 = vld [vmem:[#allocation7 + $0x30] sm:$0xff]   ;;  %vm102_vm1 = vcmask 261120   ;;  %s623_s17 = smov [#allocation10]   ;;  %vm370_vm2 = vcmask 80896  }
  0x35   :  { %440 = vmatprep.subr.bf16.mxu1 %v621_v0  ;;  %456 = vmatprep.mubr.msk.bf16.mxu1 %vm622_vm0, %v621_v0  ;;  %v76_v5 = vpack.c.bf16 %v75_v3, %v75_v3  ;;  %v493_v7 = vld [vmem:[#allocation7 + $0x28] sm:$0xff]   ;;  %v494_v8 = vld [vmem:[#allocation7 + $0x20] sm:$0xff]   ;;  %v495_v9 = vld [vmem:[#allocation7 + $0x18] sm:$0xff]   ;;  %s378_s18 = sshll.u32 %s623_s17, 4  ;;  %s379_s18 = int_to_ptr.vmem [resolvable:$true] %s378_s18 }
  0x36   :  { %433 = vmatpush3.bf16.msra.mxu0 %v489_v1  ;;  %441 = vmatpush3.bf16.msra.mxu1 %v491_v4  ;;  %v496_v10 = vld [vmem:[#allocation7 + $0x10] sm:$0xff]   ;;  %v497_v11 = vld [vmem:[#allocation7 + $0x8] sm:$0xff]   ;;  %v498_v12 = vld [vmem:[#allocation7] sm:$0xff]   ;;  %s587_s19 = scalar_lea.vmem %s379_s18, 128  ;;  %p592_p7 = scmp.lt.s32.totalorder %s379_s18, %s379_s18 }
  0x37   :  { %434 = vmatprep.subr.bf16.mxu0 %v621_v0  ;;  %442 = vmatprep.subr.bf16.mxu1 %v621_v0  ;;  %v499_v13 = vld [vmem:[#allocation8 + $0x38] sm:$0xff]   ;;  %v500_v14 = vld [vmem:[#allocation8 + $0x30] sm:$0xff]   ;;  %v501_v15 = vld [vmem:[#allocation8 + $0x28] sm:$0xff]   ;;  %p588_p6 = scmp.ne.s32.totalorder %s379_s18, %s587_s19  ;;  %p593_p8 = scmp.lt.s32.totalorder %s587_s19, %s587_s19 }
  0x38   :  { %v502_v16 = vld [vmem:[#allocation8 + $0x20] sm:$0xff]   ;;  %v503_v17 = vld [vmem:[#allocation8 + $0x18] sm:$0xff]   ;;  %v504_v18 = vld [vmem:[#allocation8 + $0x10] sm:$0xff]  }
  0x39   :  { %v389_v19 = vld [vmem:[%s715_s4] ss:$0 sm:$0xff]  ;;  %v506_v28 = vld [vmem:[#allocation8] sm:$0xff]   ;;  %v393_v29 = vld [vmem:[%s715_s4 + $0x1] ss:$0 sm:$0xff]  ;;  %p594_p9 = por %p593_p8, %p592_p7 }
  0x3a   :  { %435 = vmatpush3.bf16.msra.mxu0 %v490_v2  ;;  %443 = vmatpush3.bf16.msra.mxu1 %v492_v6  ;;  %v505_v27 = vld [vmem:[#allocation8 + $0x8] sm:$0xff]  }
  0x3b   :  { %460 = vmatprep.subr.bf16.mxu0 %v621_v0  ;;  %444 = vmatprep.subr.bf16.mxu1 %v621_v0  ;;  %v402_v37 = vld [vmem:[%s715_s4 + $0x2] ss:$0 sm:$0xff]  ;;  %p595_p10 = pnand %p594_p9, %p588_p6 }
  0x3d   :  { %437 = vmatmul.mubr.msk.bf16.vlgmr.msra.gmra.mxu0 %vm102_vm1, %v76_v5 }
  0x3e   :  { %476 = vmatprep.mubr.msk.bf16.mxu0 %vm622_vm0, %v621_v0  ;;  %445 = vmatpush3.bf16.msra.mxu1 %v493_v7 }
  0x3f   :  { %446 = vmatprep.subr.bf16.mxu1 %v621_v0  ;;  %461 = vmatpush3.bf16.msra.mxu0 %v499_v13 }
  0x40   :  { %462 = vmatprep.subr.bf16.mxu0 %v621_v0 }
  0x42   :  { %447 = vmatpush3.bf16.msra.mxu1 %v494_v8 }
  0x43   :  { %448 = vmatprep.subr.bf16.mxu1 %v621_v0  ;;  %463 = vmatpush3.bf16.msra.mxu0 %v500_v14 }
  0x44   :  { %464 = vmatprep.subr.bf16.mxu0 %v621_v0 }
  0x46   :  { %449 = vmatpush3.bf16.msra.mxu1 %v495_v9 }
  0x47   :  { %450 = vmatprep.subr.bf16.mxu1 %v621_v0  ;;  %465 = vmatpush3.bf16.msra.mxu0 %v501_v15 }
  0x48   :  { %466 = vmatprep.subr.bf16.mxu0 %v621_v0 }
  0x4a   :  { %451 = vmatpush3.bf16.msra.mxu1 %v496_v10 }
  0x4b   :  { %452 = vmatprep.subr.bf16.mxu1 %v621_v0  ;;  %467 = vmatpush3.bf16.msra.mxu0 %v502_v16 }
  0x4c   :  { %468 = vmatprep.subr.bf16.mxu0 %v621_v0 }
  0x4e   :  { %453 = vmatpush3.bf16.msra.mxu1 %v497_v11 }
  0x4f   :  { %454 = vmatprep.subr.bf16.mxu1 %v621_v0  ;;  %469 = vmatpush3.bf16.msra.mxu0 %v503_v17 }
  0x50   :  { %470 = vmatprep.subr.bf16.mxu0 %v621_v0 }
  0x52   :  { %455 = vmatpush3.bf16.msra.mxu1 %v498_v12 }
  0x53   :  { %471 = vmatpush3.bf16.msra.mxu0 %v504_v18 }
  0x54   :  { %472 = vmatprep.subr.bf16.mxu0 %v621_v0 }
  0x57   :  { %473 = vmatpush3.bf16.msra.mxu0 %v505_v27 }
  0x58   :  { %474 = vmatprep.subr.bf16.mxu0 %v621_v0 }
  0x5b   :  { %475 = vmatpush3.bf16.msra.mxu0 %v506_v28 }
  0xfd   :  { %v140_v20 = vpop.f32.mrf.mxu0 }
  0xfe   :  { %v141_v21 = vadd.f32 %v389_v19, %v140_v20 }
  0xff   :  { %v438_v22 = vpop.f32.mrf.mxu0 }
 0x100   :  { %v146_v23 = vmax.f32 %v141_v21, 0.0 }
 0x101   :  { %v143_v24 = vpop.f32.mrf.mxu0 }
 0x102   :  { %v147_v25 = vpack.c.bf16 %v146_v23, %v146_v23 }
 0x103   :  { %v439_v26 = vpop.f32.mrf.mxu0 }
 0x104   :  { %457 = vmatmul.mubr.bf16.vlgmr.msra.gmra.mxu1 %v147_v25 }
 0x1c4   :  { %v252_v30 = vpop.f32.mrf.mxu1 }
 0x1c5   :  { %v253_v31 = vadd.f32 %v393_v29, %v252_v30 }
 0x1c6   :  { %v458_v32 = vpop.f32.mrf.mxu1 }
 0x1c7   :  { %v258_v33 = vmax.f32 %v253_v31, 0.0 }
 0x1c8   :  { %v255_v34 = vpop.f32.mrf.mxu1 }
 0x1c9   :  { %v259_v35 = vpack.c.bf16 %v258_v33, %v258_v33 }
 0x1ca   :  { %v459_v36 = vpop.f32.mrf.mxu1 }
 0x1cb   :  { %477 = vmatmul.mubr.bf16.vlgmr.msra.gmra.mxu0 %v259_v35 }
 0x28b   :  { %v364_v38 = vpop.f32.mrf.mxu0 }
 0x28c   :  { %v365_v39 = vadd.f32 %v402_v37, %v364_v38 }
 0x28d   :  { %v478_v40 = vpop.f32.mrf.mxu0 }
 0x28e   :  { %371 = vst.msk [vmem:[#allocation10] sm:$0xff] %vm370_vm2, %v365_v39 }
 0x28f   :  { %v367_v41 = vpop.f32.mrf.mxu0 }
 0x290   :  { %598 = shalt.err (!%p595_p10)
}
 0x291   :  { %381 = dma.vmem_to_hbm [thread:$0]  %s379_s18, 128, %s716_s5, [#allocation4]   ;;  %v479_v42 = vpop.f32.mrf.mxu0 }
 0x292   :  { %613 = dma.done.wait [#allocation4], 128  }
 0x293   :  { %614 = vsyncadd [#allocation4], 4294967168 }
 0x294   :  { %385 = vsyncpa [#allocation3], 1 }
 0x295   :  { %386 = vsyncpa [#allocation6], 1 }
 0x296   :  { %387 = vsyncpa [#allocation9], 1 }
 0x297   :  { %388 = vsyncpa [#allocation4], 1 }

</bundles_post_ra>
